<compile_context>
chip_gen: v5e
topology: v5e:2x2
jax: 0.10.0
libtpu: 0.0.40
codegen_flags: <defaults>
</compile_context>

<pallas_src>
import functools
import math

import jax
import jax.numpy as jnp
from jax import lax
from jax.experimental import pallas as pl
from jax.experimental.pallas import tpu as pltpu

_MIB = 1024 * 1024


def _round_up(x: int, m: int) -> int:
    return -(-x // m) * m


def _tpu_vmem_bytes() -> int:
    """Physical per-core VMEM (generation aware: 128 MiB v5e/v6e, 64 MiB v7x)."""
    try:
        cap = int(pltpu.get_tpu_info().vmem_capacity_bytes)
        if cap > 0:
            return cap
    except Exception:
        pass
    return 128 * _MIB


def _device_kind() -> str:
    try:
        return jax.devices()[0].device_kind.lower()
    except Exception:
        return ""


@functools.lru_cache(maxsize=None)
def _bf16_compute_ok() -> bool:
    # v6e / v7x have bf16 VPU lanes; older generations (<= v5) would insert
    # cast pairs around every bf16 op, so keep f32 compute there.
    kind = _device_kind()
    return not any(g in kind for g in ("v2", "v3", "v4", "v5"))


@functools.lru_cache(maxsize=None)
def _argmax_supported(dtype_name: str) -> bool:
    """True iff Mosaic lowers jnp.argmax over the lane axis for this dtype AND
    tie-breaks to the lowest index (needed to match torch.topk).  Otherwise the
    knockout path uses the max + index-min fallback, which always lowers."""
    dtype = jnp.dtype(dtype_name)

    def probe(x_ref, o_ref):
        idx = jnp.argmax(x_ref[...], axis=-1, keepdims=True)
        ids = lax.broadcasted_iota(jnp.int32, x_ref.shape, 1)
        o_ref[...] = (ids == idx).astype(jnp.float32)

    # Ties at columns 1, 2, 5, 6, ... -> lowest-index winner must be column 1.
    x = jnp.tile(jnp.array([[1.0, 3.0, 3.0, 2.0]], dtype), (8, 32))
    try:
        got = jax.block_until_ready(
            pl.pallas_call(
                probe, out_shape=jax.ShapeDtypeStruct((8, 128), jnp.float32)
            )(x)
        )
    except Exception:
        return False
    want = jnp.zeros((8, 128), jnp.float32).at[:, 1].set(1.0)
    return bool(jnp.array_equal(got, want))


# --------------------------------------------------------------------------
# Kernels
# --------------------------------------------------------------------------
def _knockout_kernel(x_ref, o_ref, *, k: int, use_argmax: bool, compute_dtype):
    """k rounds of 'find the row max (lowest index on ties) and knock it out'."""
    x = x_ref[...].astype(compute_dtype)          # bf16 on v6e/v7x, f32 otherwise
    tile, d = x.shape
    neg_inf = jnp.array(-jnp.inf, dtype=compute_dtype)
    zero = jnp.array(0, dtype=compute_dtype)
    # Hoisted: Mosaic does not CSE broadcast_in_dim, so build the iota once and
    # close over it instead of regenerating a (tile, D) iota every iteration.
    ids = lax.broadcasted_iota(jnp.int32, (tile, d), 1)

    def body(_, work):
        if use_argmax:
            sel_idx = jnp.argmax(work, axis=-1, keepdims=True).astype(jnp.int32)
        else:
            row_max = jnp.max(work, axis=-1, keepdims=True)
            sel_idx = jnp.min(jnp.where(work == row_max, ids, d),
                              axis=-1, keepdims=True)
        return jnp.where(ids == sel_idx, neg_inf, work)

    work = lax.fori_loop(0, k, body, x, unroll=min(k, 8))

    # Selected lanes were knocked down to -inf, i.e. exactly where work < x.
    # (x == -inf lanes read back as "not selected"; output is still correct
    #  because the post-activation is ReLU.)
    out = jnp.where(work < x, jnp.maximum(x, zero), zero)
    o_ref[...] = out.astype(o_ref.dtype)


def _threshold_kernel(x_ref, o_ref, *, k: int, value_iters: int, shift16: bool):
    """k-independent top-k: binary search on the order-preserving int32 key of
    the values to find the k-th largest value, then a log2(D) binary search on
    the lane index among boundary ties (lowest-index tie-break)."""
    x = x_ref[...]
    tile, d = x.shape
    xf = x.astype(jnp.float32)                    # exact for bf16 / f16 inputs

    # Monotone (total-order) int32 key of the float value.
    bits = pltpu.bitcast(xf, jnp.int32)
    int_min = jnp.int32(-(2 ** 31))
    key = jnp.where(bits >= 0, bits, int_min - bits)
    if shift16:
        # bf16 inputs: the low 16 key bits are always zero, so a 16-bit search
        # range suffices (halves the value-search iterations).
        key = key >> 16

    ids = lax.broadcasted_iota(jnp.int32, (tile, d), 1)
    kk = jnp.int32(k)

    # --- value search: largest t with count(key >= t) >= k  (== k-th largest).
    lo = jnp.min(key, axis=-1, keepdims=True)
    hi = jnp.max(key, axis=-1, keepdims=True)

    def value_body(_, carry):
        lo, hi = carry
        # Overflow-safe upper midpoint: ceil((lo + hi) / 2).
        mid = (lo >> 1) + (hi >> 1) + ((lo | hi) & 1)
        cnt = jnp.sum((key >= mid).astype(jnp.int32), axis=-1, keepdims=True)
        ok = cnt >= kk
        return jnp.where(ok, mid, lo), jnp.where(ok, hi, mid - 1)

    lo, _ = lax.fori_loop(0, value_iters, value_body, (lo, hi), unroll=4)
    thr = lo                                      # (tile, 1): k-th largest key

    gt = key > thr
    eq = key == thr
    c_gt = jnp.sum(gt.astype(jnp.int32), axis=-1, keepdims=True)
    r = kk - c_gt                                 # >= 1 boundary ties to keep

    # --- index search among ties: smallest J with count(eq & idx <= J) >= r.
    lo_i = jnp.zeros((tile, 1), jnp.int32)
    hi_i = jnp.full((tile, 1), d - 1, jnp.int32)

    def index_body(_, carry):
        lo_i, hi_i = carry
        mid = (lo_i + hi_i) >> 1
        cnt = jnp.sum((eq & (ids <= mid)).astype(jnp.int32),
                      axis=-1, keepdims=True)
        ok = cnt >= r
        return jnp.where(ok, lo_i, mid + 1), jnp.where(ok, mid, hi_i)

    idx_iters = max(int(d - 1).bit_length(), 0)
    if idx_iters > 0:
        lo_i, hi_i = lax.fori_loop(0, idx_iters, index_body, (lo_i, hi_i),
                                   unroll=4)

    sel = gt | (eq & (ids <= hi_i))
    out = jnp.where(sel, jnp.maximum(xf, 0.0), 0.0)
    o_ref[...] = out.astype(o_ref.dtype)


# --------------------------------------------------------------------------
# Planning (tile size, VMEM budget, method choice)
# --------------------------------------------------------------------------
def _plan(rows: int, d: int, in_dtype, compute_dtype, row_tile=None):
    """Pick a generation-aware row tile and scoped-VMEM limit."""
    cap = _tpu_vmem_bytes()
    # ~80 MiB scoped on 128 MiB parts (v5e/v6e), ~40 MiB on 64 MiB parts (v7x).
    scoped = min(max(cap * 5 // 8, 32 * _MIB), max(cap - 16 * _MIB, 16 * _MIB))
    working = scoped // 2                         # per-grid-step working budget
    in_b = jnp.dtype(in_dtype).itemsize
    cb = jnp.dtype(compute_dtype).itemsize
    sub = max(8, 32 // min(in_b, 4))              # sublane granularity
    # ~6 live (tile, D) temporaries (x/work/key, int32 iota, masks / select
    # temps) plus double-buffered input and output blocks.
    per_row = d * (2 * cb + 6 * 4 + 4 * in_b)
    if row_tile is None:
        tile = max(sub, min(working // max(per_row, 1), 1024))
        if rows >= 2 * sub:
            # Megacore: keep >= 2 grid steps (>= 8 once tiles stay >= 512 rows)
            # so the "parallel" row axis can split across v7x's two TensorCores
            # without shrinking tiles enough to hurt v5e's DMA efficiency.
            min_steps = 8 if rows >= 8 * 512 else 2
            tile = min(tile, _round_up(-(-rows // min_steps), sub))
        tile = min(tile, _round_up(rows, sub))
        tile = max(sub, tile - tile % sub)
    else:
        tile = int(row_tile)
    # If even this tile would overflow the default scoped budget (huge SAE
    # dictionaries), ask Mosaic for more VMEM instead of silently spilling.
    vmem_limit = int(min(max(cap - 16 * _MIB, 16 * _MIB),
                         max(scoped, per_row * tile + 2 * _MIB)))
    # TODO(synk): for dictionary sizes where even an 8-row tile exceeds VMEM
    # (D >~ 200K on v7x), add a D-chunked streaming top-k (per-chunk partial
    # threshold merged across chunks) instead of carrying the full row on-chip.
    return tile, vmem_limit


def _choose_method(k: int, d: int, value_iters: int, argmax_ok: bool) -> str:
    # Rough (tile, D)-pass counts per path; threshold is k-independent.
    knockout_cost = k * (3 if argmax_ok else 5)
    threshold_cost = 2 * value_iters + 3 * max(int(d - 1).bit_length(), 1) + 12
    return "knockout" if knockout_cost <= threshold_cost else "threshold"


# --------------------------------------------------------------------------
# pallas_call wrapper
# --------------------------------------------------------------------------
@functools.partial(
    jax.jit,
    static_argnames=("k", "row_tile", "method", "use_argmax", "compute_dtype",
                     "value_iters", "vmem_limit"))
def _topk_pallas_impl(x2, *, k, row_tile, method, use_argmax, compute_dtype,
                      value_iters, vmem_limit):
    rows, d = x2.shape
    grid = pl.cdiv(rows, row_tile)                # ragged tail handled by Pallas
    if method == "knockout":
        kernel = functools.partial(_knockout_kernel, k=k, use_argmax=use_argmax,
                                   compute_dtype=jnp.dtype(compute_dtype))
    else:
        kernel = functools.partial(_threshold_kernel, k=k,
                                   value_iters=value_iters,
                                   shift16=(value_iters == 16))
    return pl.pallas_call(
        kernel,
        out_shape=jax.ShapeDtypeStruct((rows, d), x2.dtype),
        grid_spec=pltpu.PrefetchScalarGridSpec(
            num_scalar_prefetch=0,
            grid=(grid,),
            in_specs=[pl.BlockSpec((row_tile, d), lambda i: (i, 0))],
            out_specs=pl.BlockSpec((row_tile, d), lambda i: (i, 0)),
        ),
        compiler_params=pltpu.CompilerParams(
            dimension_semantics=("parallel",),
            vmem_limit_bytes=vmem_limit,
        ),
    )(x2)


def topk_pallas(x: jax.Array, *, k: int, row_tile: int | None = None,
                method: str = "auto") -> jax.Array:
    """TopK forward: keep the k largest entries along the last axis
    (lowest-index tie-break), apply ReLU to them, zero the rest."""
    orig_shape = x.shape
    d = orig_shape[-1]
    if not 1 <= k <= d:
        raise ValueError(f"k={k} must be in [1, {d}]")
    rows = math.prod(orig_shape[:-1])
    in_dtype = jnp.dtype(x.dtype)

    # bf16 compute on bf16-capable chips halves VALU work & VMEM for knockout.
    compute_dtype = (jnp.dtype(jnp.bfloat16)
                     if in_dtype == jnp.bfloat16 and _bf16_compute_ok()
                     else jnp.dtype(jnp.float32))
    value_iters = 16 if in_dtype == jnp.bfloat16 else 32

    use_argmax = False
    if method in ("auto", "knockout"):
        use_argmax = _argmax_supported(compute_dtype.name)
    if method == "auto":
        method = _choose_method(int(k), int(d), value_iters, use_argmax)
    if method not in ("knockout", "threshold"):
        raise ValueError(f"unknown method {method!r}")

    tile, vmem_limit = _plan(rows, d, in_dtype, compute_dtype, row_tile)
    # Note: D < 128 wastes lanes (masked stores); if small-D were a real use
    # case, pack multiple rows per 128-lane group in this wrapper.
    x2 = x.reshape(rows, d)
    out2 = _topk_pallas_impl(
        x2, k=int(k), row_tile=int(tile), method=method,
        use_argmax=bool(use_argmax), compute_dtype=compute_dtype.name,
        value_iters=int(value_iters), vmem_limit=int(vmem_limit))
    return out2.reshape(orig_shape)


def topk_reference(x: jax.Array, k: int) -> jax.Array:
    # Pure-JAX reference mirroring the torch module (topk -> ReLU -> scatter).
    vals, idx = lax.top_k(x, k)                   # lowest-index tie-break
    vals = jnp.maximum(vals, 0.0)                 # postact_fn = ReLU
    onehot = jax.nn.one_hot(idx, x.shape[-1], dtype=vals.dtype)
    return jnp.einsum("...k,...kd->...d", vals, onehot).astype(x.dtype)


if __name__ == "__main__":
    key = jax.random.PRNGKey(0)
    k1, k2, k3, k4, k5, k6 = jax.random.split(key, 6)

    # 1) Shape implied by SAE usage: (batch, seq, hidden), top-k over hidden.
    x1 = jax.random.normal(k1, (2, 8, 32), dtype=jnp.float32)
    o1 = jax.block_until_ready(topk_pallas(x1, k=4))
    assert o1.shape == x1.shape and o1.dtype == x1.dtype
    assert jnp.allclose(o1, topk_reference(x1, 4), atol=1e-6)

    # 2) Lane-dense D with rows NOT divisible by the row tile (ragged tail,
    #    no host-side padding).
    x2 = jax.random.normal(k2, (3, 5, 256), dtype=jnp.float32)
    o2 = jax.block_until_ready(topk_pallas(x2, k=8, row_tile=8))
    assert jnp.allclose(o2, topk_reference(x2, 8), atol=1e-6)

    # 3) bf16 activations: bf16 compute on v6e/v7x, f32 compute on older gens.
    x3 = jax.random.normal(k3, (2, 8, 128), dtype=jnp.bfloat16)
    o3 = jax.block_until_ready(topk_pallas(x3, k=4))
    assert o3.dtype == jnp.bfloat16
    assert jnp.allclose(o3.astype(jnp.float32),
                        topk_reference(x3, 4).astype(jnp.float32), atol=1e-6)

    # 4) Tie-heavy input: lowest-index tie-break must match torch.topk/lax.top_k.
    x4 = jnp.round(jax.random.normal(k4, (8, 64), dtype=jnp.float32) * 2.0) * 0.5
    o4 = jax.block_until_ready(topk_pallas(x4, k=6))
    assert jnp.allclose(o4, topk_reference(x4, 6), atol=1e-6)

    # 5) k-independent threshold path (SAE-scale k), tie-heavy to exercise the
    #    boundary index search (auto routing picks "threshold" here).
    x5 = jnp.round(jax.random.normal(k5, (8, 128), dtype=jnp.float32) * 2.0) * 0.5
    o5 = jax.block_until_ready(topk_pallas(x5, k=48))
    assert jnp.allclose(o5, topk_reference(x5, 48), atol=1e-6)

    # 6) Threshold path, bf16 (16-bit key search), forced method.
    x6 = jax.random.normal(k6, (2, 8, 128), dtype=jnp.bfloat16)
    o6 = jax.block_until_ready(topk_pallas(x6, k=40, method="threshold"))
    assert jnp.allclose(o6.astype(jnp.float32),
                        topk_reference(x6, 40).astype(jnp.float32), atol=1e-6)

    # 7) Threshold path with D not a multiple of 128 (masked lane reductions).
    o7 = jax.block_until_ready(topk_pallas(x1, k=4, method="threshold"))
    assert jnp.allclose(o7, topk_reference(x1, 4), atol=1e-6)

    print("KERNEL_OK")
</pallas_src>

<mosaic_0001>
module attributes {stable_mosaic.version = 11 : i64} {
  func.func @probe(%arg0: memref<8x128xf32, #tpu.memory_space<vmem>>, %arg1: memref<8x128xf32, #tpu.memory_space<vmem>>) attributes {dimension_semantics = [], scalar_prefetch = 0 : i64, scratch_operands = 0 : i64, tpu.core_type = #tpu.core_type<tc>} {
    %c0 = arith.constant 0 : index
    %c0_0 = arith.constant 0 : index
    %0 = vector.load %arg0[%c0, %c0_0] : memref<8x128xf32, #tpu.memory_space<vmem>>, vector<8x128xf32>
    %1 = tpu.reduce_index %0 {axis = 1 : i32, kind = #tpu.reduction_kind<arg_max>} : vector<8x128xf32> -> vector<8xi32>
    %2 = vector.shape_cast %1 : vector<8xi32> to vector<8x1xi32>
    %3 = tpu.iota {dimensions = array<i32: 1>} : vector<8x128xi32>
    %4 = vector.broadcast %2 : vector<8x1xi32> to vector<8x128xi32>
    %5 = arith.cmpi eq, %3, %4 : vector<8x128xi32>
    %6 = arith.extui %5 : vector<8x128xi1> to vector<8x128xi32>
    %7 = arith.sitofp %6 : vector<8x128xi32> to vector<8x128xf32>
    %c0_1 = arith.constant 0 : index
    %c0_2 = arith.constant 0 : index
    %8 = vector.load %arg1[%c0_1, %c0_2] : memref<8x128xf32, #tpu.memory_space<vmem>>, vector<8x128xf32>
    tpu.vector_store %arg1[%c0_1, %c0_2], %7 {strides = array<i32>} : memref<8x128xf32, #tpu.memory_space<vmem>>, vector<8x128xf32>,
    return
  }
}

module attributes {stable_mosaic.version = 11 : i64} {
  func.func @_knockout_kernel(%arg0: i32, %arg1: memref<8x32xf32, #tpu.memory_space<vmem>>, %arg2: memref<8x32xf32, #tpu.memory_space<vmem>>) attributes {dimension_semantics = [#tpu.dimension_semantics<parallel>], iteration_bounds = array<i64: 2>, scalar_prefetch = 0 : i64, scratch_operands = 0 : i64, tpu.core_type = #tpu.core_type<tc>, window_params = [{transform_indices = @transform_0, window_bounds = array<i64: 8, 32>}, {transform_indices = @transform_1, window_bounds = array<i64: 8, 32>}]} {
    %c0 = arith.constant 0 : index
    %c0_0 = arith.constant 0 : index
    %0 = vector.load %arg1[%c0, %c0_0] : memref<8x32xf32, #tpu.memory_space<vmem>>, vector<8x32xf32>
    %1 = tpu.iota {dimensions = array<i32: 1>} : vector<8x32xi32>
    %cst = arith.constant 0xFF800000 : f32
    %c0_i32 = arith.constant 0 : i32
    %cst_1 = arith.constant dense<0xFF800000> : vector<8xf32>
    %2 = vector.multi_reduction <maximumf>, %0, %cst_1 [1] : vector<8x32xf32> to vector<8xf32>
    %3 = vector.shape_cast %2 : vector<8xf32> to vector<8x1xf32>
    %4 = vector.broadcast %3 : vector<8x1xf32> to vector<8x32xf32>
    %5 = arith.cmpf oeq, %0, %4 : vector<8x32xf32>
    %c32_i32 = arith.constant 32 : i32
    %6 = vector.broadcast %c32_i32 : i32 to vector<8x32xi32>
    %7 = arith.select %5, %1, %6 : vector<8x32xi1>, vector<8x32xi32>
    %cst_2 = arith.constant dense<2147483647> : vector<8xi32>
    %8 = vector.multi_reduction <minsi>, %7, %cst_2 [1] : vector<8x32xi32> to vector<8xi32>
    %9 = vector.shape_cast %8 : vector<8xi32> to vector<8x1xi32>
    %10 = vector.broadcast %9 : vector<8x1xi32> to vector<8x32xi32>
    %11 = arith.cmpi eq, %1, %10 : vector<8x32xi32>
    %12 = vector.broadcast %cst : f32 to vector<8x32xf32>
    %13 = arith.select %11, %12, %0 : vector<8x32xi1>, vector<8x32xf32>
    %c1_i32 = arith.constant 1 : i32
    %cst_3 = arith.constant dense<0xFF800000> : vector<8xf32>
    %14 = vector.multi_reduction <maximumf>, %13, %cst_3 [1] : vector<8x32xf32> to vector<8xf32>
    %15 = vector.shape_cast %14 : vector<8xf32> to vector<8x1xf32>
    %16 = vector.broadcast %15 : vector<8x1xf32> to vector<8x32xf32>
    %17 = arith.cmpf oeq, %13, %16 : vector<8x32xf32>
    %c32_i32_4 = arith.constant 32 : i32
    %18 = vector.broadcast %c32_i32_4 : i32 to vector<8x32xi32>
    %19 = arith.select %17, %1, %18 : vector<8x32xi1>, vector<8x32xi32>
    %cst_5 = arith.constant dense<2147483647> : vector<8xi32>
    %20 = vector.multi_reduction <minsi>, %19, %cst_5 [1] : vector<8x32xi32> to vector<8xi32>
    %21 = vector.shape_cast %20 : vector<8xi32> to vector<8x1xi32>
    %22 = vector.broadcast %21 : vector<8x1xi32> to vector<8x32xi32>
    %23 = arith.cmpi eq, %1, %22 : vector<8x32xi32>
    %24 = vector.broadcast %cst : f32 to vector<8x32xf32>
    %25 = arith.select %23, %24, %13 : vector<8x32xi1>, vector<8x32xf32>
    %c2_i32 = arith.constant 2 : i32
    %cst_6 = arith.constant dense<0xFF800000> : vector<8xf32>
    %26 = vector.multi_reduction <maximumf>, %25, %cst_6 [1] : vector<8x32xf32> to vector<8xf32>
    %27 = vector.shape_cast %26 : vector<8xf32> to vector<8x1xf32>
    %28 = vector.broadcast %27 : vector<8x1xf32> to vector<8x32xf32>
    %29 = arith.cmpf oeq, %25, %28 : vector<8x32xf32>
    %c32_i32_7 = arith.constant 32 : i32
    %30 = vector.broadcast %c32_i32_7 : i32 to vector<8x32xi32>
    %31 = arith.select %29, %1, %30 : vector<8x32xi1>, vector<8x32xi32>
    %cst_8 = arith.constant dense<2147483647> : vector<8xi32>
    %32 = vector.multi_reduction <minsi>, %31, %cst_8 [1] : vector<8x32xi32> to vector<8xi32>
    %33 = vector.shape_cast %32 : vector<8xi32> to vector<8x1xi32>
    %34 = vector.broadcast %33 : vector<8x1xi32> to vector<8x32xi32>
    %35 = arith.cmpi eq, %1, %34 : vector<8x32xi32>
    %36 = vector.broadcast %cst : f32 to vector<8x32xf32>
    %37 = arith.select %35, %36, %25 : vector<8x32xi1>, vector<8x32xf32>
    %c3_i32 = arith.constant 3 : i32
    %cst_9 = arith.constant dense<0xFF800000> : vector<8xf32>
    %38 = vector.multi_reduction <maximumf>, %37, %cst_9 [1] : vector<8x32xf32> to vector<8xf32>
    %39 = vector.shape_cast %38 : vector<8xf32> to vector<8x1xf32>
    %40 = vector.broadcast %39 : vector<8x1xf32> to vector<8x32xf32>
    %41 = arith.cmpf oeq, %37, %40 : vector<8x32xf32>
    %c32_i32_10 = arith.constant 32 : i32
    %42 = vector.broadcast %c32_i32_10 : i32 to vector<8x32xi32>
    %43 = arith.select %41, %1, %42 : vector<8x32xi1>, vector<8x32xi32>
    %cst_11 = arith.constant dense<2147483647> : vector<8xi32>
    %44 = vector.multi_reduction <minsi>, %43, %cst_11 [1] : vector<8x32xi32> to vector<8xi32>
    %45 = vector.shape_cast %44 : vector<8xi32> to vector<8x1xi32>
    %46 = vector.broadcast %45 : vector<8x1xi32> to vector<8x32xi32>
    %47 = arith.cmpi eq, %1, %46 : vector<8x32xi32>
    %48 = vector.broadcast %cst : f32 to vector<8x32xf32>
    %49 = arith.select %47, %48, %37 : vector<8x32xi1>, vector<8x32xf32>
    %50 = arith.cmpf olt, %49, %0 : vector<8x32xf32>
    %cst_12 = arith.constant 0.000000e+00 : f32
    %51 = vector.broadcast %cst_12 : f32 to vector<8x32xf32>
    %52 = arith.maximumf %0, %51 : vector<8x32xf32>
    %cst_13 = arith.constant 0.000000e+00 : f32
    %53 = vector.broadcast %cst_13 : f32 to vector<8x32xf32>
    %54 = arith.select %50, %52, %53 : vector<8x32xi1>, vector<8x32xf32>
    %c0_14 = arith.constant 0 : index
    %c0_15 = arith.constant 0 : index
    %55 = vector.load %arg2[%c0_14, %c0_15] : memref<8x32xf32, #tpu.memory_space<vmem>>, vector<8x32xf32>
    tpu.vector_store %arg2[%c0_14, %c0_15], %54 {strides = array<i32>} : memref<8x32xf32, #tpu.memory_space<vmem>>, vector<8x32xf32>,
    return
  }
  func.func @transform_0(%arg0: i32) -> (i32, i32) {
    %c0_i32 = arith.constant 0 : i32
    %c0_i32_0 = arith.constant 0 : i32
    return %arg0, %c0_i32 : i32, i32
  }
  func.func @transform_1(%arg0: i32) -> (i32, i32) {
    %c0_i32 = arith.constant 0 : i32
    %c0_i32_0 = arith.constant 0 : i32
    return %arg0, %c0_i32 : i32, i32
  }
}

</mosaic_0001>

<bundles_post_ra>
// kernel: tpu_custom_call.1
= control target key start
LH: loop header
LB: loop body
LE: loop exit
PB: predicated region body
PF: predicated region fallthrough
CT: control target
= control target key end

     0   :  { %6 = vsyncpa [#allocation3], 0  ;;  %s124_s0 = inlined_call_operand.hbm [shape: f32[8,128], index: 0, kind: input, shape index: {}]   ;;  %s125_s1 = inlined_call_operand.hbm [shape: f32[8,128], index: 1, kind: output, shape index: {}]  }
   0x1   :  { %7 = vsyncpa [#allocation4], 0  ;;  %s13_s8 = sshll.u32 %s124_s0, 4  ;;  %s105_s9 = smov [#allocation2]   ;;  %s14_s8 = int_to_ptr.hbm [resolvable:$true] %s13_s8 }
   0x2   :  { %s15_s10 = sshll.u32 %s105_s9, 4  ;;  %s16_s10 = int_to_ptr.vmem [resolvable:$true] %s15_s10 }
   0x3   :  { %18 = dma.hbm_to_vmem [thread:$0]  %s14_s8, 128, %s16_s10, [#allocation3]  }
   0x4   :  { %101 = dma.done.wait [#allocation3], 128  }
   0x5   :  { %102 = vsyncadd [#allocation3], 4294967168  ;;  %v23_v0 = vld [vmem:[#allocation2] sm:$0xff]  ;;  %v26_v1 = vlaneseq  ;;  %s106_s11 = smov [#allocation5]   ;;  %s39_s15 = sshll.u32 %s125_s1, 4  ;;  %v107_v4 = vmov 0.0   ;;  %s40_s15 = int_to_ptr.hbm [resolvable:$true] %s39_s15 }
   0x6   :  { %24 = vmax.index.xlane.f32.xlu0 %v23_v0  ;;  %s37_s12 = sshll.u32 %s106_s11, 4  ;;  %s38_s12 = int_to_ptr.vmem [resolvable:$true] %s37_s12 }
   0x7   :  { %v27_v2 = vand.u32 127, %v26_v1 }
  0x79   :  { %v25_v3 = vpop.xlane.xlu0 %24 }
  0x7a   :  { %vm28_vm0 = vcmp.eq.s32.totalorder %v27_v2, %v25_v3 }
  0x7b   :  { %v49_v5 = vsel %vm28_vm0, 1.0, %v107_v4 }
  0x7c   :  { %31 = vst [vmem:[#allocation5] sm:$0xff] %v49_v5 }
  0x7d   :  { %42 = dma.vmem_to_hbm [thread:$0]  %s38_s12, 128, %s40_s15, [#allocation4]  }
  0x7e   :  { %103 = dma.done.wait [#allocation4], 128  }
  0x7f   :  { %104 = vsyncadd [#allocation4], 4294967168 }
  0x80   :  { %47 = vsyncpa [#allocation3], 1 }
  0x81   :  { %48 = vsyncpa [#allocation4], 1 }

// kernel: _topk_pallas_impl.1
= control target key start
LH: loop header
LB: loop body
LE: loop exit
PB: predicated region body
PF: predicated region fallthrough
CT: control target
= control target key end

     0   :  { %6 = vsyncpa [#allocation3], 0  ;;  %s639_s0 = inlined_call_operand.hbm [shape: f32[16,32], index: 0, kind: input, shape index: {}]   ;;  %s640_s1 = inlined_call_operand.hbm [shape: f32[16,32], index: 1, kind: output, shape index: {}]  }
   0x1   :  { %8 = vsyncpa [#allocation3 + $0x1], 0 }
   0x2   :  { %9 = vsyncpa [#allocation4], 0 }
   0x3   :  { %11 = vsyncpa [#allocation4 + $0x1], 0  ;;  %s482_s6 = smov 0   ;;  %s484_s7 = smov 0  }
   0x4   :  { %s486_s8 = smov 0   ;;  %s488_s9 = smov 0  }
   0x5 LB: > { %s503_s10 = sadd.s32 4294967295, %s470_s9   ;;  %s316_s11 = sadd.s32 4294967294, %s470_s9   ;;  %s470_s9 = sphi %s488_s9, %s650_s9   ;;  %s466_s8 = sphi %s486_s8, %s649_s8   ;;  %s462_s7 = sphi %s484_s7, %s648_s7   ;;  %s458_s6 = sphi %s482_s6, %s647_s6  }
   0x6   : > { %s507_s12 = sadd.s32 1, %s470_s9   ;;  %s24_s13 = sadd.s32 1, %s466_s8 }
   0x7   : > { %s21_s14 = ssub.s32 %s470_s9, %s507_s12  ;;  %p31_p0 = scmp.ne.s32.totalorder %s466_s8, %s462_s7 }
   0x8   : > { %p22_p1 = scmp.eq.s32.totalorder %s21_s14, 0  ;;  %p32_p2 = scmp.eq.s32.totalorder %s470_s9, 0 }
   0x9   : > { %p37_p3 = scmp.ne.s32.totalorder %s462_s7, %s458_s6  ;;  %p38_p4 = scmp.eq.s32.totalorder %s503_s10, 0 }
   0xa   : > { %s519_s15 = scalar_select %p22_p1, %s466_s8, %s24_s13  }
   0xb   : > { %p521_p5 = por %p32_p2, %p31_p0  ;;  %p525_p6 = por %p38_p4, %p37_p3 }
   0xc   : > { %p61_p7 = scmp.eq.s32.totalorder %s503_s10, 1  ;;  %p67_p8 = scmp.eq.s32.totalorder %s316_s11, 1 }
   0xd   : > { %p340_p10 = scmp.lt.s32.totalorder %s470_s9, 2  ;;  %s87_s20 = sand.u32 1, %s466_s8  }
   0xe   : > { %p532_p11 = por %p61_p7, %p31_p0  ;;  %p536_p12 = por %p67_p8, %p37_p3 }
   0xf   : > { %s320_s21 = sshll.u32 %s470_s9, 3  ;;  %s319_s22 = sshll.u32 %s87_s20, 3 }
  0x10   : > { %s95_s25 = scalar_lea.hbm %s639_s0, %s320_s21  ;;  %s91_s27 = scalar_lea.vmem [#allocation2], %s319_s22 }
  0x11   : > { %s97_s26 = sshll.u32 %s95_s25, 4  ;;  %s99_s28 = sshll.u32 %s91_s27, 4  ;;  %s98_s26 = int_to_ptr.hbm [resolvable:$true] %s97_s26  ;;  %s100_s28 = int_to_ptr.vmem [resolvable:$true] %s99_s28 }
  0x12   : > { %p547_p13 = pnand %p340_p10, %p521_p5  ;;  %p321_p0 = scmp.ge.s32.totalorder %s470_s9, 1 }
  0x13   : > { %p104_p1 = scmp.lt.s32.totalorder %s470_s9, 3  ;;  %s88_s30 = scalar_lea.sflag [#allocation3], %s87_s20 }
  0x14   : > { %s374_s2 = sshra.s32 %s98_s26, 4  ;;  %p378_p3 = pneg %p547_p13  ;;  %s375_s2 = int_to_ptr.hbm [resolvable:$true] %s374_s2 }
  0x15   : > { %s376_s3 = scalar_lea.hbm %s375_s2, 8  ;;  %s381_s11 = scalar_lea.hbm %s639_s0, 16 }
  0x16   : > { %p377_p2 = scmp.ne.s32.totalorder %s375_s2, %s376_s3  ;;  %p382_p5 = scmp.lt.s32.totalorder %s375_s2, %s639_s0 }
  0x17   : > { %p383_p8 = scmp.lt.s32.totalorder %s381_s11, %s376_s3 }
  0x18   : > { %p379_p4 = pnand %p378_p3, %p377_p2 }
  0x19   : > { %p384_p10 = por %p383_p8, %p382_p5 }
  0x1a   : > { %p380_p7 = pneg %p379_p4 }
  0x1c   : > { %p385_p9 = pnand %p384_p10, %p380_p7 }
  0x1e   : > { %388 = shalt.err (!%p385_p9)
}
  0x1f   : > { %335 = dma.hbm_to_vmem [thread:$0]  (!%p547_p13), %s98_s26, 128, %s100_s28, %s88_s30  }
  0x20   : > { %p105_p2 = pnand %p321_p0, %p104_p1 }
  0x21   : > { %s568_s16 = sand.u32 (!%p105_p2), 1, %s462_s7  }
  0x22   : > { %108 = sbr.rel (%p105_p2) target bundleno = 1502 (0x5de), region = 24  ;;  %s322_s20 = sshll.u32 (!%p105_p2), %s568_s16, 3 }
  0x23   : > { %s111_s21 = scalar_lea.sflag (!%p105_p2), [#allocation3], %s568_s16  ;;  %s114_s22 = scalar_lea.vmem (!%p105_p2), [#allocation2], %s322_s20 }
  0x27   : > { %449 = dma.done.wait (%p525_p6), %s111_s21, 128  }
  0x28   : > { %451 = vsyncadd (%p525_p6), %s111_s21, 4294967168  ;;  %vm137_vm0 = vcmask 261120   ;;  %v578_v0 = vld [vmem:[%s114_s22] sm:$0xff]  ;;  %v135_v2 = vlaneseq  ;;  %s325_s17 = sshll.u32 %s503_s10, 3  ;;  %s133_s26 = scalar_lea.vmem [#allocation5], %s322_s20 }
  0x29   : > { %v138_v1 = vsel %vm137_vm0, %v578_v0, -inf  ;;  %s241_s25 = scalar_lea.hbm %s640_s1, %s325_s17  ;;  %s243_s27 = sshll.u32 %s133_s26, 4  ;;  %s244_s27 = int_to_ptr.vmem [resolvable:$true] %s243_s27 }
  0x2a   : > { %139 = vmax.xlane.f32.xlu0 %v138_v1  ;;  %v582_v3 = vand.u32 127, %v135_v2  ;;  %s245_s28 = sshll.u32 %s241_s25, 4  ;;  %s231_s10 = scalar_lea.sflag [#allocation4], %s568_s16  ;;  %s246_s28 = int_to_ptr.hbm [resolvable:$true] %s245_s28 }
  0x2b   : > { %s418_s29 = sshra.s32 %s246_s28, 4  ;;  %s424_s4 = scalar_lea.hbm %s640_s1, 16  ;;  %s419_s29 = int_to_ptr.hbm [resolvable:$true] %s418_s29 }
  0x2c   : > { %s420_s30 = scalar_lea.hbm %s419_s29, 8  ;;  %p425_p0 = scmp.lt.s32.totalorder %s419_s29, %s640_s1 }
  0x2d   : > { %p421_p6 = scmp.ne.s32.totalorder %s419_s29, %s420_s30  ;;  %p426_p1 = scmp.lt.s32.totalorder %s424_s4, %s420_s30 }
  0x2f   : > { %p422_p9 = pnand %p421_p6, %p532_p11  ;;  %p427_p3 = por %p426_p1, %p425_p0 }
  0x31   : > { %p423_p13 = pneg %p422_p9 }
  0x33   : > { %p428_p4 = pnand %p427_p3, %p423_p13 }
  0x9d   : > { %v140_v4 = vpop.xlane.xlu0 %139 }
  0x9e   : > { %vm141_vm1 = vcmp.eq.f32.partialorder %v578_v0, %v140_v4  ;;  %v227_v4 = vmax.f32 %v578_v0, 0.0 }
  0x9f   : > { %v142_v5 = vsel %vm141_vm1, %v582_v3, 32 }
  0xa0   : > { %v143_v6 = vsel %vm137_vm0, %v142_v5, 2147483647 }
  0xa1   : > { %v145_v7 = vshra.s32 %v143_v6, 16  ;;  %v144_v9 = vand.u32 65535, %v143_v6 }
  0xa3   : > { %v147_v8 = vcvt.s32.f32 %v145_v7  ;;  %v146_v11 = vcvt.s32.f32 %v144_v9 }
  0xa5   : > { %148 = vmin.xlane.f32.xlu0 %v147_v8 }
 0x118   : > { %v149_v10 = vpop.xlane.xlu0 %148 }
 0x119   : > { %vm150_vm2 = vcmp.eq.f32.partialorder %v147_v8, %v149_v10  ;;  %v155_v13 = vcvt.f32.s32 %v149_v10 }
 0x11a   : > { %v151_v12 = vsel %vm150_vm2, %v146_v11, inf }
 0x11b   : > { %152 = vmin.xlane.f32.xlu1 %v151_v12  ;;  %v156_v15 = vshll.u32 %v155_v13, 16 }
 0x18e   : > { %v153_v14 = vpop.xlane.xlu1 %152 }
 0x18f   : > { %v154_v16 = vcvt.f32.s32 %v153_v14 }
 0x191   : > { %v157_v17 = vadd.s32 %v156_v15, %v154_v16 }
 0x193   : > { %vm158_vm3 = vcmp.eq.s32.totalorder %v582_v3, %v157_v17 }
 0x194   : > { %v159_v18 = vsel %vm158_vm3, -inf, %v578_v0 }
 0x195   : > { %v160_v19 = vsel %vm137_vm0, %v159_v18, -inf }
 0x196   : > { %161 = vmax.xlane.f32.xlu1 %v160_v19 }
 0x209   : > { %v162_v20 = vpop.xlane.xlu1 %161 }
 0x20a   : > { %vm163_vm4 = vcmp.eq.f32.partialorder %v159_v18, %v162_v20 }
 0x20b   : > { %v164_v21 = vsel %vm163_vm4, %v582_v3, 32 }
 0x20c   : > { %v165_v22 = vsel %vm137_vm0, %v164_v21, 2147483647 }
 0x20d   : > { %v167_v23 = vshra.s32 %v165_v22, 16  ;;  %v166_v25 = vand.u32 65535, %v165_v22 }
 0x20f   : > { %v169_v24 = vcvt.s32.f32 %v167_v23  ;;  %v168_v27 = vcvt.s32.f32 %v166_v25 }
 0x211   : > { %170 = vmin.xlane.f32.xlu2 %v169_v24 }
 0x284   : > { %v171_v26 = vpop.xlane.xlu2 %170 }
 0x285   : > { %vm172_vm5 = vcmp.eq.f32.partialorder %v169_v24, %v171_v26  ;;  %v177_v29 = vcvt.f32.s32 %v171_v26 }
 0x286   : > { %v173_v28 = vsel %vm172_vm5, %v168_v27, inf }
 0x287   : > { %174 = vmin.xlane.f32.xlu2 %v173_v28  ;;  %v178_v31 = vshll.u32 %v177_v29, 16 }
 0x2fa   : > { %v175_v30 = vpop.xlane.xlu2 %174 }
 0x2fb   : > { %v176_v32 = vcvt.f32.s32 %v175_v30 }
 0x2fd   : > { %v179_v33 = vadd.s32 %v178_v31, %v176_v32 }
 0x2ff   : > { %vm180_vm6 = vcmp.eq.s32.totalorder %v582_v3, %v179_v33 }
 0x300   : > { %v181_v34 = vsel %vm180_vm6, -inf, %v159_v18 }
 0x301   : > { %v182_v35 = vsel %vm137_vm0, %v181_v34, -inf }
 0x302   : > { %183 = vmax.xlane.f32.xlu0 %v182_v35 }
 0x375   : > { %v184_v36 = vpop.xlane.xlu0 %183 }
 0x376   : > { %vm185_vm7 = vcmp.eq.f32.partialorder %v181_v34, %v184_v36 }
 0x377   : > { %v186_v37 = vsel %vm185_vm7, %v582_v3, 32 }
 0x378   : > { %v187_v38 = vsel %vm137_vm0, %v186_v37, 2147483647 }
 0x379   : > { %v189_v39 = vshra.s32 %v187_v38, 16  ;;  %v188_v41 = vand.u32 65535, %v187_v38 }
 0x37b   : > { %v191_v40 = vcvt.s32.f32 %v189_v39  ;;  %v190_v43 = vcvt.s32.f32 %v188_v41 }
 0x37d   : > { %192 = vmin.xlane.f32.xlu1 %v191_v40 }
 0x3f0   : > { %v193_v42 = vpop.xlane.xlu1 %192 }
 0x3f1   : > { %vm194_vm8 = vcmp.eq.f32.partialorder %v191_v40, %v193_v42  ;;  %v199_v45 = vcvt.f32.s32 %v193_v42 }
 0x3f2   : > { %v195_v44 = vsel %vm194_vm8, %v190_v43, inf }
 0x3f3   : > { %196 = vmin.xlane.f32.xlu2 %v195_v44  ;;  %v200_v47 = vshll.u32 %v199_v45, 16 }
 0x466   : > { %v197_v46 = vpop.xlane.xlu2 %196 }
 0x467   : > { %v198_v48 = vcvt.f32.s32 %v197_v46 }
 0x469   : > { %v201_v49 = vadd.s32 %v200_v47, %v198_v48 }
 0x46b   : > { %vm202_vm9 = vcmp.eq.s32.totalorder %v582_v3, %v201_v49 }
 0x46c   : > { %v203_v50 = vsel %vm202_vm9, -inf, %v181_v34 }
 0x46d   : > { %v204_v51 = vsel %vm137_vm0, %v203_v50, -inf }
 0x46e   : > { %205 = vmax.xlane.f32.xlu0 %v204_v51 }
 0x4e1   : > { %v206_v52 = vpop.xlane.xlu0 %205 }
 0x4e2   : > { %vm207_vm10 = vcmp.eq.f32.partialorder %v203_v50, %v206_v52 }
 0x4e3   : > { %v208_v53 = vsel %vm207_vm10, %v582_v3, 32 }
 0x4e4   : > { %v209_v54 = vsel %vm137_vm0, %v208_v53, 2147483647 }
 0x4e5   : > { %v211_v55 = vshra.s32 %v209_v54, 16  ;;  %v210_v57 = vand.u32 65535, %v209_v54 }
 0x4e7   : > { %v213_v56 = vcvt.s32.f32 %v211_v55  ;;  %v212_v59 = vcvt.s32.f32 %v210_v57 }
 0x4e9   : > { %214 = vmin.xlane.f32.xlu1 %v213_v56 }
 0x55c   : > { %v215_v58 = vpop.xlane.xlu1 %214 }
 0x55d   : > { %vm216_vm11 = vcmp.eq.f32.partialorder %v213_v56, %v215_v58  ;;  %v221_v61 = vcvt.f32.s32 %v215_v58 }
 0x55e   : > { %v217_v60 = vsel %vm216_vm11, %v212_v59, inf }
 0x55f   : > { %218 = vmin.xlane.f32.xlu2 %v217_v60  ;;  %v222_v63 = vshll.u32 %v221_v61, 16 }
 0x5d2   : > { %v219_v62 = vpop.xlane.xlu2 %218 }
 0x5d3   : > { %v220_v1 = vcvt.f32.s32 %v219_v62 }
 0x5d5   : > { %v223_v2 = vadd.s32 %v222_v63, %v220_v1 }
 0x5d7   : > { %vm224_vm12 = vcmp.eq.s32.totalorder %v582_v3, %v223_v2 }
 0x5d8   : > { %v225_v5 = vsel %vm224_vm12, -inf, %v203_v50 }
 0x5d9   : > { %vm226_vm13 = vcmp.lt.f32.partialorder %v225_v5, %v578_v0 }
 0x5da   : > { %v228_v6 = vsel %vm226_vm13, %v227_v4, 0.0 }
 0x5db   : > { %229 = vst.msk [vmem:[%s133_s26] sm:$0xff] %vm137_vm0, %v228_v6 }
 0x5dc   : > { %431 = shalt.err (!%p428_p4)
}
 0x5dd   : > { %330 = dma.vmem_to_hbm [thread:$0]  (%p532_p11), %s244_s27, 128, %s246_s28, %s231_s10  }
 0x5de PF: > { %s257_s13 = sand.u32 1, %s458_s6   ;;  %p646_p7 = scmp.ge.s32.totalorder %s470_s9, 2 }
 0x5df   : > { %s258_s14 = scalar_lea.sflag [#allocation4], %s257_s13 }
 0x5e0   : > { %p337_p5 = pnand %p646_p7, %p536_p12 }
 0x5e2   : > { %p338_p8 = pneg %p337_p5 }
 0x5e4   : > { %453 = dma.done.wait (%p338_p8), %s258_s14, 128  }
 0x5e5   : > { %455 = vsyncadd (%p338_p8), %s258_s14, 4294967168  ;;  %p14_p10 = scmp.ge.s32.totalorder %s507_s12, 4   ;;  %s647_s6 = smov %s462_s7 }
 0x5e6   : > { %s648_s7 = smov %s466_s8  ;;  %s649_s8 = smov %s519_s15 }
 0x5e7   : > { %s650_s9 = smov %s507_s12  ;;  %16 = sbr.rel (!%p14_p10) target bundleno = 5 (0x5), region = 69 }
 0x5ec   :  { %264 = vsyncpa [#allocation3], 1 }
 0x5ed   :  { %266 = vsyncpa [#allocation3 + $0x1], 1 }
 0x5ee   :  { %267 = vsyncpa [#allocation4], 1 }
 0x5ef   :  { %269 = vsyncpa [#allocation4 + $0x1], 1 }

</bundles_post_ra>
